<compile_context>
chip_gen: v7x
topology: tpu7x:2x2x1
jax: 0.10.0
libtpu: 0.0.40
codegen_flags: <defaults>
</compile_context>

<pallas_src>
import functools

import jax
import jax.numpy as jnp
from jax.experimental import pallas as pl
from jax.experimental.pallas import tpu as pltpu

LOG_SIG_MAX = 2.0
LOG_SIG_MIN = -20.0

LANE = 128  # TPU lane width; head output is padded to a multiple of this.


def _round_up(x, m):
    return ((x + m - 1) // m) * m


def _gaussian_actor_kernel(state_ref, w_in_ref, w_hid_ref, b_mlp_ref,
                           w_head_ref, b_head_ref, out_ref, *, action_dim):
    x = state_ref[...]

    # h = relu(state @ W_in + b_in)
    h = jnp.dot(x, w_in_ref[...], preferred_element_type=jnp.float32)
    h = jnp.maximum(h + b_mlp_ref[0:1, :], 0.0)

    # h = relu(h @ W_hid + b_hid)
    h = jnp.dot(h, w_hid_ref[...], preferred_element_type=jnp.float32)
    h = jnp.maximum(h + b_mlp_ref[1:2, :], 0.0)

    # Fused heads: one lane-dense matmul producing [mean | log_std | pad].
    y = jnp.dot(h, w_head_ref[...], preferred_element_type=jnp.float32)
    y = y + b_head_ref[...]

    # Clamp only the log_std columns [action_dim, 2*action_dim).
    cols = jax.lax.broadcasted_iota(jnp.int32, y.shape, dimension=1)
    is_logstd = (cols >= action_dim) & (cols < 2 * action_dim)
    y = jnp.where(is_logstd, jnp.clip(y, LOG_SIG_MIN, LOG_SIG_MAX), y)

    out_ref[...] = y


def pack_params(params):
    """Pack the 8 PyTorch-layout tensors into 5 kernel operands (done once)."""
    (w_in, b_in, w_hid, b_hid, w_mean, b_mean, w_logstd, b_logstd) = params
    hidden_dim = w_in.shape[1]
    action_dim = w_mean.shape[1]
    out_pad = _round_up(2 * action_dim, LANE)

    b_mlp = jnp.concatenate([b_in.reshape(1, hidden_dim),
                             b_hid.reshape(1, hidden_dim)], axis=0)  # (2, H)

    w_head = jnp.concatenate([w_mean, w_logstd], axis=1)             # (H, 2A)
    w_head = jnp.pad(w_head, ((0, 0), (0, out_pad - 2 * action_dim)))
    b_head = jnp.concatenate([b_mean.reshape(1, -1),
                              b_logstd.reshape(1, -1)], axis=1)      # (1, 2A)
    b_head = jnp.pad(b_head, ((0, 0), (0, out_pad - 2 * action_dim)))

    return (w_in, w_hid, b_mlp, w_head, b_head)


def gaussian_actor_forward(state, packed, action_dim):
    w_in, w_hid, b_mlp, w_head, b_head = packed
    batch, state_dim = state.shape
    hidden_dim = w_in.shape[1]
    out_pad = w_head.shape[1]

    # Batch tiling: TM rows per grid step (multiple of 8), batch zero-padded.
    tm = min(512, _round_up(batch, 8))
    batch_pad = _round_up(batch, tm)
    if batch_pad != batch:
        state = jnp.pad(state, ((0, batch_pad - batch), (0, 0)))
    grid = (batch_pad // tm,)

    kernel = functools.partial(_gaussian_actor_kernel, action_dim=action_dim)

    flops = 2 * batch_pad * (state_dim * hidden_dim
                             + hidden_dim * hidden_dim
                             + hidden_dim * out_pad)
    bytes_accessed = 4 * (batch_pad * state_dim            # state in
                          + state_dim * hidden_dim         # w_in
                          + hidden_dim * hidden_dim        # w_hid
                          + 2 * hidden_dim                 # b_mlp
                          + hidden_dim * out_pad           # w_head
                          + out_pad                        # b_head
                          + batch_pad * out_pad)           # output slab

    slab = pl.pallas_call(
        kernel,
        out_shape=jax.ShapeDtypeStruct((batch_pad, out_pad), jnp.float32),
        grid=grid,
        in_specs=[
            pl.BlockSpec((tm, state_dim), lambda i: (i, 0)),          # state
            pl.BlockSpec((state_dim, hidden_dim), lambda i: (0, 0)),  # w_in
            pl.BlockSpec((hidden_dim, hidden_dim), lambda i: (0, 0)), # w_hid
            pl.BlockSpec((2, hidden_dim), lambda i: (0, 0)),          # b_mlp
            pl.BlockSpec((hidden_dim, out_pad), lambda i: (0, 0)),    # w_head
            pl.BlockSpec((1, out_pad), lambda i: (0, 0)),             # b_head
        ],
        out_specs=pl.BlockSpec((tm, out_pad), lambda i: (i, 0)),
        compiler_params=pltpu.CompilerParams(
            dimension_semantics=("parallel",)),
        cost_estimate=pl.CostEstimate(
            flops=flops, transcendentals=0, bytes_accessed=bytes_accessed),
    )(state, w_in, w_hid, b_mlp, w_head, b_head)

    mean = slab[:batch, :action_dim]
    log_std = slab[:batch, action_dim:2 * action_dim]
    return mean, log_std


# ---------------------------------------------------------------------------
# Initialization (matches the PyTorch module's weights_init_) and reference.
# ---------------------------------------------------------------------------
def xavier_uniform(key, fan_in, fan_out):
    # torch.nn.init.xavier_uniform_ (gain=1): U(-a, a), a = sqrt(6/(fan_in+fan_out)).
    # Stored as (fan_in, fan_out) = transpose of PyTorch's (out, in).
    bound = jnp.sqrt(6.0 / (fan_in + fan_out))
    return jax.random.uniform(
        key, (fan_in, fan_out), dtype=jnp.float32, minval=-bound, maxval=bound
    )


def init_params(key, state_dim, hidden_dim, action_dim):
    k1, k2, k3, k4 = jax.random.split(key, 4)
    w_in = xavier_uniform(k1, state_dim, hidden_dim)
    b_in = jnp.zeros((1, hidden_dim), jnp.float32)
    w_hid = xavier_uniform(k2, hidden_dim, hidden_dim)
    b_hid = jnp.zeros((1, hidden_dim), jnp.float32)
    w_mean = xavier_uniform(k3, hidden_dim, action_dim)
    b_mean = jnp.zeros((1, action_dim), jnp.float32)
    w_logstd = xavier_uniform(k4, hidden_dim, action_dim)
    b_logstd = jnp.zeros((1, action_dim), jnp.float32)
    return (w_in, b_in, w_hid, b_hid, w_mean, b_mean, w_logstd, b_logstd)


def reference_forward(state, params):
    (w_in, b_in, w_hid, b_hid, w_mean, b_mean, w_logstd, b_logstd) = params
    h = jnp.maximum(state @ w_in + b_in, 0.0)
    h = jnp.maximum(h @ w_hid + b_hid, 0.0)
    mean = h @ w_mean + b_mean
    log_std = jnp.clip(h @ w_logstd + b_logstd, LOG_SIG_MIN, LOG_SIG_MAX)
    return mean, log_std


if __name__ == "__main__":
    state_dim, hidden_dim, action_dim = 16, 32, 8
    batch = 4

    key = jax.random.PRNGKey(0)
    k_params, k_state = jax.random.split(key)
    params = init_params(k_params, state_dim, hidden_dim, action_dim)
    packed = pack_params(params)
    state = jax.random.normal(k_state, (batch, state_dim), dtype=jnp.float32)

    mean, log_std = gaussian_actor_forward(state, packed, action_dim)
    jax.block_until_ready((mean, log_std))

    # Sanity-check against a pure-JAX reference of the same forward pass.
    mean_ref, log_std_ref = reference_forward(state, params)
    assert mean.shape == (batch, action_dim)
    assert log_std.shape == (batch, action_dim)
    assert jnp.allclose(mean, mean_ref, atol=1e-5), "mean mismatch"
    assert jnp.allclose(log_std, log_std_ref, atol=1e-5), "log_std mismatch"

    # Also exercise a batch large enough to tile (multiple grid steps, padding).
    big_state = jax.random.normal(jax.random.PRNGKey(2), (1000, state_dim),
                                  dtype=jnp.float32)
    big_mean, big_logstd = gaussian_actor_forward(big_state, packed, action_dim)
    jax.block_until_ready((big_mean, big_logstd))
    big_mean_ref, big_logstd_ref = reference_forward(big_state, params)
    assert jnp.allclose(big_mean, big_mean_ref, atol=1e-5), "big mean mismatch"
    assert jnp.allclose(big_logstd, big_logstd_ref, atol=1e-5), "big log_std mismatch"

    print("KERNEL_OK")
</pallas_src>

<mosaic_0001>
module attributes {stable_mosaic.version = 11 : i64} {
  func.func @_gaussian_actor_kernel(%arg0: i32, %arg1: memref<8x16xf32, #tpu.memory_space<vmem>>, %arg2: memref<16x32xf32, #tpu.memory_space<vmem>>, %arg3: memref<32x32xf32, #tpu.memory_space<vmem>>, %arg4: memref<2x32xf32, #tpu.memory_space<vmem>>, %arg5: memref<32x128xf32, #tpu.memory_space<vmem>>, %arg6: memref<1x128xf32, #tpu.memory_space<vmem>>, %arg7: memref<8x128xf32, #tpu.memory_space<vmem>>) attributes {dimension_semantics = [#tpu.dimension_semantics<parallel>], iteration_bounds = array<i64: 1>, scalar_prefetch = 0 : i64, scratch_operands = 0 : i64, tpu.core_type = #tpu.core_type<tc>, window_params = [{transform_indices = @transform_0, window_bounds = array<i64: 8, 16>}, {pipeline_mode = #tpu.pipeline_mode<synchronous>, transform_indices = @transform_1, window_bounds = array<i64: 16, 32>}, {pipeline_mode = #tpu.pipeline_mode<synchronous>, transform_indices = @transform_2, window_bounds = array<i64: 32, 32>}, {pipeline_mode = #tpu.pipeline_mode<synchronous>, transform_indices = @transform_3, window_bounds = array<i64: 2, 32>}, {pipeline_mode = #tpu.pipeline_mode<synchronous>, transform_indices = @transform_4, window_bounds = array<i64: 32, 128>}, {pipeline_mode = #tpu.pipeline_mode<synchronous>, transform_indices = @transform_5, window_bounds = array<i64: 1, 128>}, {transform_indices = @transform_6, window_bounds = array<i64: 8, 128>}]} {
    %c0 = arith.constant 0 : index
    %c0_0 = arith.constant 0 : index
    %0 = vector.load %arg1[%c0, %c0_0] : memref<8x16xf32, #tpu.memory_space<vmem>>, vector<8x16xf32>
    %c0_1 = arith.constant 0 : index
    %c0_2 = arith.constant 0 : index
    %1 = vector.load %arg2[%c0_1, %c0_2] : memref<16x32xf32, #tpu.memory_space<vmem>>, vector<16x32xf32>
    %cst = arith.constant dense<0.000000e+00> : vector<8x32xf32>
    %2 = tpu.matmul %0, %1, %cst {dimension_numbers = #tpu.dot_dimension_numbers<[1], [0], [0], [1], [0, 0, 1, 1], [], []>} : vector<8x16xf32>, vector<16x32xf32>, vector<8x32xf32> -> vector<8x32xf32>
    %c0_3 = arith.constant 0 : index
    %c0_4 = arith.constant 0 : index
    %3 = vector.load %arg4[%c0_3, %c0_4] : memref<2x32xf32, #tpu.memory_space<vmem>>, vector<1x32xf32>
    %4 = vector.broadcast %3 : vector<1x32xf32> to vector<8x32xf32>
    %5 = arith.addf %2, %4 : vector<8x32xf32>
    %cst_5 = arith.constant 0.000000e+00 : f32
    %6 = vector.broadcast %cst_5 : f32 to vector<8x32xf32>
    %7 = arith.maximumf %5, %6 : vector<8x32xf32>
    %c0_6 = arith.constant 0 : index
    %c0_7 = arith.constant 0 : index
    %8 = vector.load %arg3[%c0_6, %c0_7] : memref<32x32xf32, #tpu.memory_space<vmem>>, vector<32x32xf32>
    %cst_8 = arith.constant dense<0.000000e+00> : vector<8x32xf32>
    %9 = tpu.matmul %7, %8, %cst_8 {dimension_numbers = #tpu.dot_dimension_numbers<[1], [0], [0], [1], [0, 0, 1, 1], [], []>} : vector<8x32xf32>, vector<32x32xf32>, vector<8x32xf32> -> vector<8x32xf32>
    %c1 = arith.constant 1 : index
    %c0_9 = arith.constant 0 : index
    %10 = vector.load %arg4[%c1, %c0_9] : memref<2x32xf32, #tpu.memory_space<vmem>>, vector<1x32xf32>
    %11 = vector.broadcast %10 : vector<1x32xf32> to vector<8x32xf32>
    %12 = arith.addf %9, %11 : vector<8x32xf32>
    %cst_10 = arith.constant 0.000000e+00 : f32
    %13 = vector.broadcast %cst_10 : f32 to vector<8x32xf32>
    %14 = arith.maximumf %12, %13 : vector<8x32xf32>
    %c0_11 = arith.constant 0 : index
    %c0_12 = arith.constant 0 : index
    %15 = vector.load %arg5[%c0_11, %c0_12] : memref<32x128xf32, #tpu.memory_space<vmem>>, vector<32x128xf32>
    %cst_13 = arith.constant dense<0.000000e+00> : vector<8x128xf32>
    %16 = tpu.matmul %14, %15, %cst_13 {dimension_numbers = #tpu.dot_dimension_numbers<[1], [0], [0], [1], [0, 0, 1, 1], [], []>} : vector<8x32xf32>, vector<32x128xf32>, vector<8x128xf32> -> vector<8x128xf32>
    %c0_14 = arith.constant 0 : index
    %c0_15 = arith.constant 0 : index
    %17 = vector.load %arg6[%c0_14, %c0_15] : memref<1x128xf32, #tpu.memory_space<vmem>>, vector<1x128xf32>
    %18 = vector.broadcast %17 : vector<1x128xf32> to vector<8x128xf32>
    %19 = arith.addf %16, %18 : vector<8x128xf32>
    %20 = tpu.iota {dimensions = array<i32: 1>} : vector<8x128xi32>
    %c8_i32 = arith.constant 8 : i32
    %21 = vector.broadcast %c8_i32 : i32 to vector<8x128xi32>
    %22 = arith.cmpi sge, %20, %21 : vector<8x128xi32>
    %c16_i32 = arith.constant 16 : i32
    %23 = vector.broadcast %c16_i32 : i32 to vector<8x128xi32>
    %24 = arith.cmpi slt, %20, %23 : vector<8x128xi32>
    %25 = arith.andi %22, %24 : vector<8x128xi1>
    %cst_16 = arith.constant -2.000000e+01 : f32
    %cst_17 = arith.constant 2.000000e+00 : f32
    %26 = vector.broadcast %cst_16 : f32 to vector<8x128xf32>
    %27 = arith.maximumf %26, %19 : vector<8x128xf32>
    %28 = vector.broadcast %cst_17 : f32 to vector<8x128xf32>
    %29 = arith.minimumf %28, %27 : vector<8x128xf32>
    %30 = arith.select %25, %29, %19 : vector<8x128xi1>, vector<8x128xf32>
    %c0_18 = arith.constant 0 : index
    %c0_19 = arith.constant 0 : index
    %31 = vector.load %arg7[%c0_18, %c0_19] : memref<8x128xf32, #tpu.memory_space<vmem>>, vector<8x128xf32>
    tpu.vector_store %arg7[%c0_18, %c0_19], %30 {strides = array<i32>} : memref<8x128xf32, #tpu.memory_space<vmem>>, vector<8x128xf32>,
    return
  }
  func.func @transform_0(%arg0: i32) -> (i32, i32) {
    %c0_i32 = arith.constant 0 : i32
    %c0_i32_0 = arith.constant 0 : i32
    return %arg0, %c0_i32 : i32, i32
  }
  func.func @transform_1(%arg0: i32) -> (i32, i32) {
    %c0_i32 = arith.constant 0 : i32
    %c0_i32_0 = arith.constant 0 : i32
    %c0_i32_1 = arith.constant 0 : i32
    return %c0_i32, %c0_i32_0 : i32, i32
  }
  func.func @transform_2(%arg0: i32) -> (i32, i32) {
    %c0_i32 = arith.constant 0 : i32
    %c0_i32_0 = arith.constant 0 : i32
    %c0_i32_1 = arith.constant 0 : i32
    return %c0_i32, %c0_i32_0 : i32, i32
  }
  func.func @transform_3(%arg0: i32) -> (i32, i32) {
    %c0_i32 = arith.constant 0 : i32
    %c0_i32_0 = arith.constant 0 : i32
    %c0_i32_1 = arith.constant 0 : i32
    return %c0_i32, %c0_i32_0 : i32, i32
  }
  func.func @transform_4(%arg0: i32) -> (i32, i32) {
    %c0_i32 = arith.constant 0 : i32
    %c0_i32_0 = arith.constant 0 : i32
    %c0_i32_1 = arith.constant 0 : i32
    return %c0_i32, %c0_i32_0 : i32, i32
  }
  func.func @transform_5(%arg0: i32) -> (i32, i32) {
    %c0_i32 = arith.constant 0 : i32
    %c0_i32_0 = arith.constant 0 : i32
    %c0_i32_1 = arith.constant 0 : i32
    return %c0_i32, %c0_i32_0 : i32, i32
  }
  func.func @transform_6(%arg0: i32) -> (i32, i32) {
    %c0_i32 = arith.constant 0 : i32
    %c0_i32_0 = arith.constant 0 : i32
    return %arg0, %c0_i32 : i32, i32
  }
}

</mosaic_0001>

<bundles_post_ra>
// kernel: tpu_custom_call.1
= control target key start
LH: loop header
LB: loop body
LE: loop exit
PB: predicated region body
PF: predicated region fallthrough
CT: control target
= control target key end

     0   :  { %11 = vsyncpa [#allocation3], 0  ;;  %s671_s0 = inlined_call_operand.hbm [shape: f32[8,16], index: 0, kind: input, shape index: {}]   ;;  %s672_s1 = inlined_call_operand.hbm [shape: f32[16,32], index: 1, kind: input, shape index: {}]   ;;  %s673_s2 = inlined_call_operand.hbm [shape: f32[32,32], index: 2, kind: input, shape index: {}]   ;;  %s674_s3 = inlined_call_operand.vmem [shape: f32[2,32], index: 3, kind: input, shape index: {}]   ;;  %s675_s4 = inlined_call_operand.hbm [shape: f32[32,128], index: 4, kind: input, shape index: {}]   ;;  %s676_s5 = inlined_call_operand.vmem [shape: f32[1,128], index: 5, kind: input, shape index: {}]   ;;  %s677_s6 = inlined_call_operand.hbm [shape: f32[8,128], index: 6, kind: output, shape index: {}]  }
   0x1   :  { %12 = vsyncpa [#allocation6], 0 }
   0x2   :  { %13 = vsyncpa [#allocation9], 0 }
   0x3   :  { %14 = vsyncpa [#allocation4], 0  ;;  %s545_s21 = smov [#allocation5]   ;;  %s427_s25 = scalar_lea.hbm %s672_s1, 256 }
   0x4   :  { %s30_s22 = sshll.u32 %s545_s21, 4  ;;  %p428_p0 = scmp.ne.s32.totalorder %s672_s1, %s427_s25  ;;  %s31_s22 = int_to_ptr.vmem [resolvable:$true] %s30_s22 }
   0x5   :  { %p431_p1 = scmp.lt.u32.totalorder %s427_s25, %s672_s1 }
   0x7   :  { %p433_p2 = pnand %p431_p1, %p428_p0 }
   0x9   :  { %436 = shalt.err (!%p433_p2)
}
   0xa   :  { %s437_s30 = scalar_lea.vmem %s31_s22, 256  ;;  %p442_p4 = scmp.lt.s32.totalorder %s31_s22, %s31_s22 }
   0xb   :  { %p438_p3 = scmp.ne.s32.totalorder %s31_s22, %s437_s30  ;;  %p443_p5 = scmp.lt.s32.totalorder %s437_s30, %s437_s30 }
   0xd   :  { %p444_p6 = por %p443_p5, %p442_p4 }
   0xf   :  { %p445_p7 = pnand %p444_p6, %p438_p3 }
  0x11   :  { %448 = shalt.err (!%p445_p7)
}
  0x12   :  { %s546_s7 = smov 128   ;;  %s547_s8 = smov 8  }
  0x13   :  { %36 = dma.hbm_to_vmem [thread:$0]  %s672_s1, 256, %s31_s22, [#allocation6], %s546_s7, %s546_s7, %s547_s8  }
  0x14   :  { %s548_s11 = smov [#allocation2]   ;;  %s549_s13 = smov [#allocation7]  }
  0x15   :  { %s21_s12 = sshll.u32 %s548_s11, 4  ;;  %s42_s14 = sshll.u32 %s549_s13, 4  ;;  %s22_s12 = int_to_ptr.vmem [resolvable:$true] %s21_s12  ;;  %s43_s14 = int_to_ptr.vmem [resolvable:$true] %s42_s14 }
  0x16   :  { %s449_s17 = scalar_lea.hbm %s671_s0, 128 }
  0x17   :  { %p450_p8 = scmp.ne.s32.totalorder %s671_s0, %s449_s17  ;;  %p453_p9 = scmp.lt.u32.totalorder %s449_s17, %s671_s0 }
  0x19   :  { %p455_p10 = pnand %p453_p9, %p450_p8 }
  0x1b   :  { %458 = shalt.err (!%p455_p10)
}
  0x1c   :  { %s459_s1 = scalar_lea.vmem %s22_s12, 128  ;;  %p464_p12 = scmp.lt.s32.totalorder %s22_s12, %s22_s12 }
  0x1d   :  { %p460_p11 = scmp.ne.s32.totalorder %s22_s12, %s459_s1  ;;  %p465_p13 = scmp.lt.s32.totalorder %s459_s1, %s459_s1 }
  0x1f   :  { %p466_p0 = por %p465_p13, %p464_p12 }
  0x21   :  { %p467_p1 = pnand %p466_p0, %p460_p11 }
  0x23   :  { %470 = shalt.err (!%p467_p1)
}
  0x24   :  { %24 = dma.hbm_to_vmem [thread:$0]  %s671_s0, 128, %s22_s12, [#allocation3]  }
  0x25   :  { %s471_s26 = scalar_lea.hbm %s673_s2, 512 }
  0x26   :  { %p472_p2 = scmp.ne.s32.totalorder %s673_s2, %s471_s26  ;;  %p475_p3 = scmp.lt.u32.totalorder %s471_s26, %s673_s2 }
  0x28   :  { %p477_p4 = pnand %p475_p3, %p472_p2 }
  0x2a   :  { %480 = shalt.err (!%p477_p4)
}
  0x2b   :  { %s481_s9 = scalar_lea.vmem %s43_s14, 512  ;;  %p486_p6 = scmp.lt.s32.totalorder %s43_s14, %s43_s14 }
  0x2c   :  { %p482_p5 = scmp.ne.s32.totalorder %s43_s14, %s481_s9  ;;  %p487_p7 = scmp.lt.s32.totalorder %s481_s9, %s481_s9 }
  0x2e   :  { %p488_p8 = por %p487_p7, %p486_p6 }
  0x30   :  { %p489_p9 = pnand %p488_p8, %p482_p5 }
  0x32   :  { %492 = shalt.err (!%p489_p9)
}
  0x33   :  { %48 = dma.hbm_to_vmem [thread:$0]  %s673_s2, 512, %s43_s14, [#allocation6], %s546_s7, %s546_s7, %s547_s8  }
  0x34   :  { %s550_s11 = smov [#allocation8]   ;;  %s493_s16 = scalar_lea.hbm %s675_s4, 512 }
  0x35   :  { %s56_s12 = sshll.u32 %s550_s11, 4  ;;  %p494_p10 = scmp.ne.s32.totalorder %s675_s4, %s493_s16  ;;  %s57_s12 = int_to_ptr.vmem [resolvable:$true] %s56_s12 }
  0x36   :  { %p497_p11 = scmp.lt.u32.totalorder %s493_s16, %s675_s4 }
  0x38   :  { %p499_p12 = pnand %p497_p11, %p494_p10 }
  0x3a   :  { %502 = shalt.err (!%p499_p12)
}
  0x3b   :  { %s503_s21 = scalar_lea.vmem %s57_s12, 512  ;;  %p508_p0 = scmp.lt.s32.totalorder %s57_s12, %s57_s12 }
  0x3c   :  { %p504_p13 = scmp.ne.s32.totalorder %s57_s12, %s503_s21  ;;  %p509_p1 = scmp.lt.s32.totalorder %s503_s21, %s503_s21 }
  0x3e   :  { %p510_p2 = por %p509_p1, %p508_p0 }
  0x40   :  { %p511_p3 = pnand %p510_p2, %p504_p13 }
  0x42   :  { %514 = shalt.err (!%p511_p3)
}
  0x43   :  { %62 = dma.hbm_to_vmem [thread:$0]  %s675_s4, 512, %s57_s12, [#allocation9], %s546_s7, %s546_s7, %s547_s8  }
  0x44   :  { %537 = dma.done.wait [#allocation3], 128  }
  0x45   :  { %538 = vsyncadd [#allocation3], 4294967168 }
  0x46   :  { %539 = dma.done.wait [#allocation6], 768  }
  0x47   :  { %540 = vsyncadd [#allocation6], 4294966528 }
  0x48   :  { %541 = dma.done.wait [#allocation9], 512  }
  0x49   :  { %542 = vsyncadd [#allocation9], 4294966784  ;;  %v551_v0 = vmov 0.0|0.0   ;;  %vm552_vm0 = vmmov 0   ;;  %v553_v1 = vmov 0.0   ;;  %v78_v2 = vld [vmem:[#allocation5] sm:$0xff]  ;;  %v328_v28 = vlaneseq }
  0x4a   :  { %402 = vmatprep.subr.bf16.mxu0 %v551_v0  ;;  %377 = vmatprep.mubr.msk.f32.mxu0 %vm552_vm0, %v553_v1  ;;  %v79_v3 = vld [vmem:[#allocation5 + $0x8] sm:$0xff]  ;;  %v160_v5 = vld [vmem:[#allocation7] sm:$0xff]  ;;  %v161_v6 = vld [vmem:[#allocation7 + $0x8] sm:$0xff]  ;;  %vm85_vm1 = vcmask 130048   ;;  %vm169_vm2 = vcmask 261120   ;;  %s554_s24 = smov [#allocation10]  }
  0x4b   :  { %405 = vmatprep.subr.bf16.mxu1 %v551_v0  ;;  %388 = vmatprep.mubr.msk.f32.mxu1 %vm552_vm0, %v553_v1  ;;  %v403_v4 = vpack.c.bf16 %v79_v3, %v78_v2  ;;  %v406_v7 = vpack.c.bf16 %v161_v6, %v160_v5  ;;  %v77_v8 = vld [vmem:[#allocation2] sm:$0xff]  ;;  %v162_v9 = vld [vmem:[#allocation7 + $0x10] sm:$0xff]  ;;  %v163_v10 = vld [vmem:[#allocation7 + $0x18] sm:$0xff]  ;;  %v329_v29 = vand.u32 127, %v328_v28  ;;  %s343_s25 = sshll.u32 %s554_s24, 4  ;;  %s344_s25 = int_to_ptr.vmem [resolvable:$true] %s343_s25 }
  0x4c   :  { %v409_v11 = vpack.c.bf16 %v163_v10, %v162_v9  ;;  %v244_v12 = vld [vmem:[#allocation8] sm:$0xff]  ;;  %v245_v13 = vld [vmem:[#allocation8 + $0x8] sm:$0xff]  ;;  %v246_v20 = vld [vmem:[#allocation8 + $0x10] sm:$0xff]  ;;  %p520_p5 = scmp.lt.s32.totalorder %s344_s25, %s344_s25 }
  0x4d   :  { %404 = vmatpush3.bf16.msra.mxu0 %v403_v4  ;;  %407 = vmatpush3.bf16.msra.mxu1 %v406_v7  ;;  %v412_v14 = vpack.c.bf16 %v245_v13, %v244_v12  ;;  %v354_v15 = vld [vmem:[%s674_s3] ss:$0 sm:$0xff]  ;;  %v247_v21 = vld [vmem:[#allocation8 + $0x18] sm:$0xff]  ;;  %v356_v23 = vld [vmem:[%s674_s3 + $0x1] ss:$0 sm:$0xff]  ;;  %vm330_vm3 = vcmp.ge.s32.totalorder %v329_v29, 8 }
  0x4e   :  { %411 = vmatprep.subr.bf16.mxu0 %v551_v0  ;;  %408 = vmatprep.subr.bf16.mxu1 %v551_v0  ;;  %v415_v22 = vpack.c.bf16 %v247_v21, %v246_v20  ;;  %v358_v30 = vld [vmem:[%s676_s5] ss:$0 sm:$0xff]  ;;  %vm331_vm4 = vcmp.lt.s32.totalorder %v329_v29, 16  ;;  %s515_s3 = scalar_lea.vmem %s344_s25, 128 }
  0x4f   :  { %vm332_vm5 = vmand %vm330_vm3, %vm331_vm4  ;;  %p516_p4 = scmp.ne.s32.totalorder %s344_s25, %s515_s3  ;;  %p521_p6 = scmp.lt.s32.totalorder %s515_s3, %s515_s3 }
  0x50   :  { %378 = vmatmul.mubr.msk.f32.vlgmr.msra.gmra.mrb[0].mxu0 %vm85_vm1, %v77_v8 }
  0x51   :  { %399 = vmatprep.mubr.msk.f32.mxu0 %vm552_vm0, %v553_v1  ;;  %410 = vmatpush3.bf16.msra.mxu1 %v409_v11  ;;  %p522_p7 = por %p521_p6, %p520_p5 }
  0x52   :  { %413 = vmatpush3.bf16.msra.mxu0 %v412_v14 }
  0x53   :  { %414 = vmatprep.subr.bf16.mxu0 %v551_v0  ;;  %p523_p8 = pnand %p522_p7, %p516_p4 }
  0x56   :  { %416 = vmatpush3.bf16.msra.mxu0 %v415_v22 }
 0x123   :  { %v155_v16 = vpop.f32.mrb[0].mxu0 }
 0x124   :  { %v156_v17 = vadd.f32 %v354_v15, %v155_v16  ;;  %v379_v18 = vpop.f32.mrb[1].mxu0 }
 0x126   :  { %v159_v19 = vmax.f32 %v156_v17, 0.0 }
 0x128   :  { %389 = vmatmul.mubr.msk.f32.vlgmr.msra.gmra.mrb[0].mxu1 %vm169_vm2, %v159_v19 }
 0x1fb   :  { %v239_v24 = vpop.f32.mrb[0].mxu1 }
 0x1fc   :  { %v240_v25 = vadd.f32 %v356_v23, %v239_v24  ;;  %v390_v26 = vpop.f32.mrb[1].mxu1 }
 0x1fe   :  { %v243_v27 = vmax.f32 %v240_v25, 0.0 }
 0x200   :  { %400 = vmatmul.mubr.msk.f32.vlgmr.msra.gmra.mrb[2].mxu0 %vm169_vm2, %v243_v27 }
 0x2d3   :  { %v324_v31 = vpop.f32.mrb[2].mxu0 }
 0x2d4   :  { %v325_v32 = vadd.f32 %v358_v30, %v324_v31  ;;  %v401_v33 = vpop.f32.mrb[3].mxu0 }
 0x2d6   :  { %v333_v34 = vmax.f32 %v325_v32, -20.0 }
 0x2d8   :  { %v334_v35 = vmin.f32 %v333_v34, 2.0 }
 0x2da   :  { %v335_v36 = vsel %vm332_vm5, %v334_v35, %v325_v32 }
 0x2db   :  { %336 = vst [vmem:[#allocation10] sm:$0xff] %v335_v36 }
 0x2dc   :  { %526 = shalt.err (!%p523_p8)
}
 0x2dd   :  { %s527_s27 = scalar_lea.hbm %s677_s6, 128 }
 0x2de   :  { %p528_p9 = scmp.ne.s32.totalorder %s677_s6, %s527_s27  ;;  %p531_p10 = scmp.lt.u32.totalorder %s527_s27, %s677_s6 }
 0x2e0   :  { %p533_p11 = pnand %p531_p10, %p528_p9 }
 0x2e2   :  { %536 = shalt.err (!%p533_p11)
}
 0x2e3   :  { %346 = dma.vmem_to_hbm [thread:$0]  %s344_s25, 128, %s677_s6, [#allocation4]  }
 0x2e4   :  { %543 = dma.done.wait [#allocation4], 128  }
 0x2e5   :  { %544 = vsyncadd [#allocation4], 4294967168 }
 0x2e6   :  { %350 = vsyncpa [#allocation3], 1 }
 0x2e7   :  { %351 = vsyncpa [#allocation6], 1 }
 0x2e8   :  { %352 = vsyncpa [#allocation9], 1 }
 0x2e9   :  { %353 = vsyncpa [#allocation4], 1 }

</bundles_post_ra>
